<compile_context>
chip_gen: v6e
topology: v6e:2x2x1
jax: 0.10.0
libtpu: 0.0.40
codegen_flags: <defaults>
</compile_context>

<pallas_src>
import functools
import math

import jax
import jax.numpy as jnp
from jax.experimental import pallas as pl
from jax.experimental.pallas import tpu as pltpu


# ---------------------------------------------------------------------------
# Pallas kernels
# ---------------------------------------------------------------------------

def _hstack_matmul_kernel(a_ref, b_ref, bias_ref, o_ref, acc_ref):
    """out[rows] = sum_k A[rows, k-tile] @ B[k-tile] + bias   (f32 accumulation)."""
    @pl.when(pl.program_id(1) == 0)
    def _():
        acc_ref[...] = jnp.zeros_like(acc_ref)

    acc_ref[...] += jnp.dot(a_ref[...], b_ref[...],
                            preferred_element_type=jnp.float32)

    @pl.when(pl.program_id(1) == pl.num_programs(1) - 1)
    def _():
        o_ref[...] = (acc_ref[...] + bias_ref[...]).astype(o_ref.dtype)


def _per_relation_xw_kernel(x_ref, w_ref, s_ref, o_ref):
    """out[r*ntiles + i] = (X[i-tile] @ W[r]) * inv_deg[r, i-tile]  (relation squeezed)."""
    xw = jnp.dot(x_ref[...], w_ref[...], preferred_element_type=jnp.float32)
    o_ref[...] = (xw * s_ref[...]).astype(o_ref.dtype)


def _fused_layer1_kernel(a_ref, x_ref, w_ref, s_ref, bias_ref, o_ref, acc_ref, *, kpr):
    """Fused RGCN layer 1: B tile built in-kernel (no xw HBM round trip).

    Per grid step (i, k):  rel = k // kpr ;  rows = (k % kpr)-th node-row tile
        B = (nodes[rows] @ W1[rel]) * inv_deg[k-tile]          (f32 -> bf16)
        acc += A_counts[i-tile, k-tile] @ B                    (f32 accumulation)
    """
    k = pl.program_id(1)

    @pl.when(k == 0)
    def _():
        acc_ref[...] = jnp.zeros_like(acc_ref)

    rel = k // kpr
    xw = jnp.dot(x_ref[...], w_ref[rel], preferred_element_type=jnp.float32)
    xw = (xw * s_ref[...]).astype(a_ref.dtype)
    acc_ref[...] += jnp.dot(a_ref[...], xw, preferred_element_type=jnp.float32)

    @pl.when(k == pl.num_programs(1) - 1)
    def _():
        o_ref[...] = (acc_ref[...] + bias_ref[...]).astype(o_ref.dtype)


# ---------------------------------------------------------------------------
# Tiling helpers
# ---------------------------------------------------------------------------

def _round_up(x, m):
    return ((x + m - 1) // m) * m


_TM_CANDIDATES = (16, 32, 64, 128, 256, 512)


def _choose_tiles(n, R):
    """Pick (tm, n_pad) minimizing ~HBM bytes: n_pad^2 * R * (1 + 128/tm).

    Keeps >=2 row tiles whenever n_pad >= 32 (so v7x's two TensorCores both work),
    and bounds padding blow-up (n_pad is never rounded to more than needed by tm)."""
    best_tm, best_np, best_cost = 16, _round_up(n, 16), None
    for tm in _TM_CANDIDATES:
        n_pad = _round_up(n, tm)
        if n_pad >= 32 and n_pad // tm < 2:
            continue
        cost = (n_pad ** 2) * R * (1.0 + 128.0 / tm)
        if best_cost is None or cost < best_cost:
            best_tm, best_np, best_cost = tm, n_pad, cost
    # Guard: avoid a huge single unaligned K tile (K = R*n_pad not a 128 multiple).
    if (R * best_np) % 128 != 0 and R * best_np > 8192:
        best_np = _round_up(best_np, 128)
        best_tm = max(t for t in _TM_CANDIDATES
                      if best_np % t == 0 and (best_np // t >= 2 or best_np < 32))
    return best_tm, best_np


def _choose_k_tile(K, max_tk=2048):
    """Largest 128-multiple divisor of K (<= max_tk); full-width if K isn't 128-aligned."""
    if K % 128 != 0:
        return K                       # small-graph case: one full K tile (= full dim)
    tk, d = 128, 256
    while d <= min(K, max_tk):
        if K % d == 0:
            tk = d
        d += 128
    return tk


def _choose_fused_k_tile(n_pad, max_tk=2048):
    """Largest 128-multiple divisor of n_pad (<= max_tk); requires n_pad % 128 == 0."""
    tk, d = 128, 256
    while d <= min(n_pad, max_tk):
        if n_pad % d == 0:
            tk = d
        d += 128
    return tk


def _vmem_limit_bytes(need):
    # Cap at 48 MiB: headroom under v7x's 64 MiB/TC (v5e/v6e have 128 MiB, so generous).
    return int(min(48 * 2 ** 20, max(4 * need, 16 * 2 ** 20)))


# ---------------------------------------------------------------------------
# Pallas wrappers
# ---------------------------------------------------------------------------

def hstack_matmul_bias(a, b, bias, *, tm, tk, out_dtype=jnp.float32):
    """a: (n_pad, K), b: (K, h1_pad), bias: (1, h1_pad) -> (n_pad, h1_pad) in out_dtype."""
    n_pad, k_tot = a.shape
    h1_pad = b.shape[1]
    assert n_pad % tm == 0 and k_tot % tk == 0 and h1_pad % 128 == 0

    ba, bb = a.dtype.itemsize, b.dtype.itemsize
    bo = jnp.dtype(out_dtype).itemsize
    vmem_need = (2 * tm * tk * ba + 2 * tk * h1_pad * bb
                 + 2 * h1_pad * 4 + 2 * tm * h1_pad * bo + tm * h1_pad * 4)
    cost = pl.CostEstimate(
        flops=2 * n_pad * k_tot * h1_pad,
        transcendentals=0,
        bytes_accessed=(n_pad * k_tot * ba + (n_pad // tm) * k_tot * h1_pad * bb
                        + n_pad * h1_pad * bo + h1_pad * 4))

    return pl.pallas_call(
        _hstack_matmul_kernel,
        out_shape=jax.ShapeDtypeStruct((n_pad, h1_pad), out_dtype),
        grid_spec=pltpu.PrefetchScalarGridSpec(
            num_scalar_prefetch=0,
            grid=(n_pad // tm, k_tot // tk),            # rows parallel, K reduction last
            in_specs=[
                pl.BlockSpec((tm, tk), lambda i, k: (i, k)),          # A row/K tile
                pl.BlockSpec((tk, h1_pad), lambda i, k: (k, 0)),      # B K tile (lane-dense)
                pl.BlockSpec((1, h1_pad), lambda i, k: (0, 0)),       # bias, resident
            ],
            out_specs=pl.BlockSpec((tm, h1_pad), lambda i, k: (i, 0)),
            scratch_shapes=[pltpu.VMEM((tm, h1_pad), jnp.float32)]),
        compiler_params=pltpu.CompilerParams(
            dimension_semantics=("parallel", "arbitrary"),
            vmem_limit_bytes=_vmem_limit_bytes(vmem_need)),
        cost_estimate=cost,
    )(a, b, bias)


def per_relation_xw(x, w, scale, *, tm):
    """Unfused layer-1 B operand.

    x: (n_pad, h0_pad), w: (R, h0_pad, h1_pad), scale: (R, n_pad, 1)
      -> (R*n_pad, h1_pad) in x.dtype, rows already scaled by 1/degree (no extra pad)."""
    n_pad, h0_pad = x.shape
    R, _, h1_pad = w.shape
    assert n_pad % tm == 0 and h0_pad % 128 == 0 and h1_pad % 128 == 0
    ntiles = n_pad // tm

    itm = x.dtype.itemsize
    cost = pl.CostEstimate(
        flops=2 * R * n_pad * h0_pad * h1_pad,
        transcendentals=0,
        bytes_accessed=(n_pad * h0_pad * itm + R * h0_pad * h1_pad * w.dtype.itemsize
                        + R * n_pad * 4 + R * n_pad * h1_pad * itm))

    return pl.pallas_call(
        _per_relation_xw_kernel,
        out_shape=jax.ShapeDtypeStruct((R * n_pad, h1_pad), x.dtype),
        grid_spec=pltpu.PrefetchScalarGridSpec(
            num_scalar_prefetch=0,
            grid=(ntiles, R),
            in_specs=[
                pl.BlockSpec((tm, h0_pad), lambda i, r: (i, 0)),       # X rows (resident over r)
                pl.BlockSpec((pl.Squeezed(), h0_pad, h1_pad),
                             lambda i, r: (r, 0, 0)),                  # W_r
                pl.BlockSpec((pl.Squeezed(), tm, 1),
                             lambda i, r: (r, i, 0)),                  # 1/degree rows
            ],
            out_specs=pl.BlockSpec((tm, h1_pad),
                                   lambda i, r, nt=ntiles: (r * nt + i, 0))),
        compiler_params=pltpu.CompilerParams(
            dimension_semantics=("parallel", "arbitrary"),
            vmem_limit_bytes=int(32 * 2 ** 20)),
        cost_estimate=cost,
    )(x, w, scale)


def fused_rgcn_layer(a, x, w1, scale_col, bias, *, tm, tk, out_dtype=jnp.float32):
    """Fused layer 1: out = A_counts @ vstack_r((1/deg ⊙ nodes) @ W1_r) + bias.

    a: (n_pad, R*n_pad) counts, x: (n_pad, h0_pad) nodes, w1: (R, h0_pad, h1_pad),
    scale_col: (R*n_pad, 1) 1/degree, bias: (1, h1_pad).  Requires tk | n_pad."""
    n_pad, k_tot = a.shape
    R, h0_pad, h1_pad = w1.shape
    assert n_pad % tm == 0 and n_pad % tk == 0 and k_tot == R * n_pad
    kpr = n_pad // tk

    ba, bx, bw = a.dtype.itemsize, x.dtype.itemsize, w1.dtype.itemsize
    vmem_need = (2 * tm * tk * ba + 2 * tk * h0_pad * bx + 2 * R * h0_pad * h1_pad * bw
                 + 2 * tk * 4 + 2 * h1_pad * 4 + 2 * tm * h1_pad * 4 + tm * h1_pad * 4)
    cost = pl.CostEstimate(
        flops=2 * n_pad * k_tot * h1_pad
              + 2 * (n_pad // tm) * k_tot * h0_pad * h1_pad,
        transcendentals=0,
        bytes_accessed=(n_pad * k_tot * ba + (n_pad // tm) * n_pad * h0_pad * bx
                        + R * h0_pad * h1_pad * bw + k_tot * 4 + n_pad * h1_pad * 4))

    kernel = functools.partial(_fused_layer1_kernel, kpr=kpr)
    return pl.pallas_call(
        kernel,
        out_shape=jax.ShapeDtypeStruct((n_pad, h1_pad), out_dtype),
        grid_spec=pltpu.PrefetchScalarGridSpec(
            num_scalar_prefetch=0,
            grid=(n_pad // tm, k_tot // tk),
            in_specs=[
                pl.BlockSpec((tm, tk), lambda i, k: (i, k)),                  # A counts tile
                pl.BlockSpec((tk, h0_pad), lambda i, k, m=kpr: (k % m, 0)),   # node rows of this K tile
                pl.BlockSpec((R, h0_pad, h1_pad), lambda i, k: (0, 0, 0)),    # W1, fully resident
                pl.BlockSpec((tk, 1), lambda i, k: (k, 0)),                   # 1/degree column scale
                pl.BlockSpec((1, h1_pad), lambda i, k: (0, 0)),               # bias, resident
            ],
            out_specs=pl.BlockSpec((tm, h1_pad), lambda i, k: (i, 0)),
            scratch_shapes=[pltpu.VMEM((tm, h1_pad), jnp.float32)]),
        compiler_params=pltpu.CompilerParams(
            dimension_semantics=("parallel", "arbitrary"),
            vmem_limit_bytes=_vmem_limit_bytes(vmem_need)),
        cost_estimate=cost,
    )(a, x, w1, scale_col, bias)


# ---------------------------------------------------------------------------
# Graph / parameter glue (plain JAX)
# ---------------------------------------------------------------------------

def add_inverse_and_self(triples, n, r):
    """Same ordering as the PyTorch helper: [triples, self-loops, inverses]."""
    inv = jnp.stack([triples[:, 2], triples[:, 1] + r, triples[:, 0]], axis=1)
    all_n = jnp.arange(n, dtype=triples.dtype)
    slf = jnp.stack([all_n, jnp.full((n,), 2 * r, dtype=triples.dtype), all_n], axis=1)
    return jnp.concatenate([triples, slf, inv], axis=0)


def build_adjacency_counts(triples_plus, n, n_pad, R, dtype):
    """Unnormalized horizontally-stacked adjacency counts + exact column 1/degree.

    A_counts[s, p*n_pad + o] = #duplicates of (s,p,o)  (exact in bf16 for counts <= 256)
    inv_deg[c] = 1 / (#edges in column c)  (f32, exactly the PyTorch normalization),
    0 for empty columns (their A column is all-zero so they never contribute).
    """
    s, p, o = triples_plus[:, 0], triples_plus[:, 1], triples_plus[:, 2]
    K = R * n_pad
    col = p * n_pad + o
    counts = jnp.zeros((K,), jnp.float32).at[col].add(1.0)
    inv_deg = jnp.where(counts > 0, 1.0 / jnp.maximum(counts, 1.0), 0.0)
    A = jnp.zeros((n_pad, K), jnp.float32).at[s, col].add(1.0)
    # TODO(synk): int8 (v5e/v6e) / fp8 (v7x) storage would halve the dominant A stream.
    return A.astype(dtype), inv_deg


def xavier_uniform_relu(key, shape):
    """torch.nn.init.xavier_uniform_(gain=calculate_gain('relu')) for a (r, h0, h1) tensor."""
    r_, h0, h1 = shape
    fan_in, fan_out = h0 * h1, r_ * h1
    gain = math.sqrt(2.0)
    bound = gain * math.sqrt(6.0 / (fan_in + fan_out))
    return jax.random.uniform(key, shape, jnp.float32, -bound, bound)


class LinkPredictionPallas:
    """Classic RGCN wired for link prediction (depth=2, decomp=None, no score biases,
    eval mode: no edge/triple dropout, no subgraph pruning).  No activation between the
    two layers, matching the reference module."""

    def __init__(self, key, triples, n, r, depth=2, hidden=16, out=16, init=0.85,
                 compute_dtype=jnp.bfloat16):
        assert depth == 2, "only depth=2 implemented (matches default)"
        self.n, self.r = n, r
        self.R = 2 * r + 1                           # relations + inverses + self-loop
        self.hidden, self.out = hidden, out
        self.compute_dtype = compute_dtype

        # ---- tiling ----
        self.tm, self.n_pad = _choose_tiles(n, self.R)
        self.K = self.R * self.n_pad                 # K_pad == R*n_pad exactly (no col pad)
        self.tk = _choose_k_tile(self.K)
        self.h_hid_pad = _round_up(hidden, 128)
        self.h_out_pad = _round_up(out, 128)
        self.fuse_layer1 = (self.n_pad % 128 == 0)   # fused K tiles must align to relations
        self.tk1 = _choose_fused_k_tile(self.n_pad) if self.fuse_layer1 else None

        # ---- graph ----
        self.triples_plus = add_inverse_and_self(triples, n, r)
        self.A_counts, inv_deg = build_adjacency_counts(
            self.triples_plus, n, self.n_pad, self.R, compute_dtype)
        self.inv_deg_col = inv_deg.reshape(self.K, 1)                 # fused path
        self.inv_deg_rel = inv_deg.reshape(self.R, self.n_pad, 1)     # unfused path

        # ---- parameters (true shapes) ----
        k0, k1, k2 = jax.random.split(key, 3)
        self.w0 = xavier_uniform_relu(k0, (self.R, n, hidden))        # layer0 (one-hot in)
        self.b0 = jnp.zeros((hidden,), jnp.float32)
        self.w1 = xavier_uniform_relu(k1, (self.R, hidden, out))      # layer1
        self.b1 = jnp.zeros((out,), jnp.float32)
        self.relations = jax.random.uniform(k2, (r, out), jnp.float32, -init, init)

        # ---- zero-padded kernel operands; exact 1/degree folded into B rows ----
        w0_pad = jnp.zeros((self.R, self.n_pad, self.h_hid_pad), jnp.float32)
        w0_pad = w0_pad.at[:, :n, :hidden].set(self.w0)
        w0_flat = w0_pad.reshape(self.K, self.h_hid_pad)
        self.w0_flat = (w0_flat * inv_deg[:, None]).astype(compute_dtype)
        self.b0_pad = jnp.zeros((1, self.h_hid_pad), jnp.float32).at[0, :hidden].set(self.b0)

        w1_pad = jnp.zeros((self.R, self.h_hid_pad, self.h_out_pad), jnp.float32)
        w1_pad = w1_pad.at[:, :hidden, :out].set(self.w1)
        self.w1_pad = w1_pad.astype(compute_dtype)
        self.b1_pad = jnp.zeros((1, self.h_out_pad), jnp.float32).at[0, :out].set(self.b1)

        # TODO(synk): prune-subgraph extraction, training-time edge/triple dropout,
        # basis/block weight decompositions and score biases are not exercised by the
        # default eval-mode forward and are not implemented here.

    # -------- RGCN encoder (Pallas hot path) --------
    def encode(self):
        # layer0 (one-hot inputs): out = A_counts @ (1/deg ⊙ vstack_p(W0_p)) + b0, emit bf16
        nodes = hstack_matmul_bias(self.A_counts, self.w0_flat, self.b0_pad,
                                   tm=self.tm, tk=self.tk,
                                   out_dtype=self.compute_dtype)      # (n_pad, h_hid_pad)

        # layer1: out = A_counts @ vstack_p((1/deg ⊙ X) @ W1_p) + b1
        if self.fuse_layer1:
            nodes = fused_rgcn_layer(self.A_counts, nodes, self.w1_pad,
                                     self.inv_deg_col, self.b1_pad,
                                     tm=self.tm, tk=self.tk1,
                                     out_dtype=jnp.float32)           # (n_pad, h_out_pad)
        else:
            xw = per_relation_xw(nodes, self.w1_pad, self.inv_deg_rel,
                                 tm=self.tm)                          # (K, h_out_pad)
            nodes = hstack_matmul_bias(self.A_counts, xw, self.b1_pad,
                                       tm=self.tm, tk=self.tk,
                                       out_dtype=jnp.float32)

        return nodes[:self.n, :self.out]                              # drop padding

    def __call__(self, batch):
        assert batch.shape[-1] == 3
        dims = batch.shape[:-1]
        flat = batch.reshape(-1, 3)

        nodes = self.encode()

        # -------- DistMult decoder (plain JAX: trivial op, per perf review) --------
        si, pi, oi = flat[:, 0], flat[:, 1], flat[:, 2]
        scores = jnp.sum(nodes[si] * self.relations[pi] * nodes[oi], axis=-1)
        return scores.reshape(dims)


# ---------------------------------------------------------------------------
# Demo + f32 reference check
# ---------------------------------------------------------------------------

def _reference_nodes(model):
    """Pure-JAX f32 dense reference of the 2-layer RGCN encoder (PyTorch semantics)."""
    n, R = model.n, model.R
    t = model.triples_plus
    s, p, o = t[:, 0], t[:, 1], t[:, 2]
    col = p * n + o
    counts = jnp.zeros((R * n,), jnp.float32).at[col].add(1.0)
    vals = 1.0 / counts[col]
    A = jnp.zeros((n, R * n), jnp.float32).at[s, col].add(vals)
    h = A @ model.w0.reshape(R * n, model.hidden) + model.b0
    xw = jnp.einsum('ni,rio->rno', h, model.w1).reshape(R * n, model.out)
    return A @ xw + model.b1


if __name__ == "__main__":
    key = jax.random.PRNGKey(0)

    def make_graph(k, n, r, E):
        ks, kp, ko = jax.random.split(k, 3)
        s = jax.random.randint(ks, (E,), 0, n)
        p = jax.random.randint(kp, (E,), 0, r)
        o = jax.random.randint(ko, (E,), 0, n)
        return jnp.stack([s, p, o], axis=1).astype(jnp.int32)

    # Case 1 exercises the small-graph (unfused) path; case 2 the fused layer-1 kernel.
    for (n, r, hidden, out, E) in [(16, 3, 32, 16, 40), (128, 2, 16, 16, 300)]:
        kg, kparam, kb = jax.random.split(jax.random.fold_in(key, n), 3)
        triples = make_graph(kg, n, r, E)

        model = LinkPredictionPallas(kparam, triples, n, r,
                                     depth=2, hidden=hidden, out=out, init=0.85)

        nodes = jax.block_until_ready(model.encode())
        ref = jax.block_until_ready(_reference_nodes(model))
        err = float(jnp.max(jnp.abs(nodes - ref)))
        tol = 0.08 * float(jnp.max(jnp.abs(ref))) + 1e-5      # bf16 compute vs f32 ref
        assert err <= tol, (n, err, tol)

        bs = jax.random.randint(jax.random.fold_in(kb, 0), (2, 4), 0, n)
        bp = jax.random.randint(jax.random.fold_in(kb, 1), (2, 4), 0, r)
        bo = jax.random.randint(jax.random.fold_in(kb, 2), (2, 4), 0, n)
        batch = jnp.stack([bs, bp, bo], axis=-1).astype(jnp.int32)    # (2, 4, 3)

        scores = jax.block_until_ready(model(batch))
        assert scores.shape == (2, 4)
        assert scores.dtype == jnp.float32
        assert bool(jnp.all(jnp.isfinite(scores)))

    print("KERNEL_OK")
</pallas_src>

<mosaic_0001>
module attributes {stable_mosaic.version = 11 : i64} {
  func.func @_hstack_matmul_kernel(%arg0: i32, %arg1: i32, %arg2: memref<16x112xbf16, #tpu.memory_space<vmem>>, %arg3: memref<112x128xbf16, #tpu.memory_space<vmem>>, %arg4: memref<1x128xf32, #tpu.memory_space<vmem>>, %arg5: memref<16x128xbf16, #tpu.memory_space<vmem>>, %arg6: memref<16x128xf32, #tpu.memory_space<vmem>>) attributes {dimension_semantics = [#tpu.dimension_semantics<parallel>, #tpu.dimension_semantics<arbitrary>], iteration_bounds = array<i64: 1, 1>, scalar_prefetch = 0 : i64, scratch_operands = 1 : i64, tpu.core_type = #tpu.core_type<tc>, window_params = [{transform_indices = @transform_0, window_bounds = array<i64: 16, 112>}, {transform_indices = @transform_1, window_bounds = array<i64: 112, 128>}, {pipeline_mode = #tpu.pipeline_mode<synchronous>, transform_indices = @transform_2, window_bounds = array<i64: 1, 128>}, {transform_indices = @transform_3, window_bounds = array<i64: 16, 128>}]} {
    %c0_i32 = arith.constant 0 : i32
    %0 = arith.cmpi eq, %arg1, %c0_i32 : i32
    %1 = arith.extui %0 : i1 to i32
    %c0_i32_0 = arith.constant 0 : i32
    %2 = arith.cmpi ne, %1, %c0_i32_0 : i32
    scf.if %2 {
      %cst_10 = arith.constant 0.000000e+00 : f32
      %12 = vector.broadcast %cst_10 : f32 to vector<16x128xf32>
      %c0_11 = arith.constant 0 : index
      %c0_12 = arith.constant 0 : index
      %13 = vector.load %arg6[%c0_11, %c0_12] : memref<16x128xf32, #tpu.memory_space<vmem>>, vector<16x128xf32>
      tpu.vector_store %arg6[%c0_11, %c0_12], %12 {strides = array<i32>} : memref<16x128xf32, #tpu.memory_space<vmem>>, vector<16x128xf32>,
    } else {
    }
    %c0 = arith.constant 0 : index
    %c0_1 = arith.constant 0 : index
    %3 = vector.load %arg6[%c0, %c0_1] : memref<16x128xf32, #tpu.memory_space<vmem>>, vector<16x128xf32>
    %c0_2 = arith.constant 0 : index
    %c0_3 = arith.constant 0 : index
    %4 = vector.load %arg2[%c0_2, %c0_3] : memref<16x112xbf16, #tpu.memory_space<vmem>>, vector<16x112xbf16>
    %c0_4 = arith.constant 0 : index
    %c0_5 = arith.constant 0 : index
    %5 = vector.load %arg3[%c0_4, %c0_5] : memref<112x128xbf16, #tpu.memory_space<vmem>>, vector<112x128xbf16>
    %cst = arith.constant dense<0.000000e+00> : vector<16x128xf32>
    %6 = tpu.matmul %4, %5, %cst {dimension_numbers = #tpu.dot_dimension_numbers<[1], [0], [0], [1], [0, 0, 1, 1], [], []>} : vector<16x112xbf16>, vector<112x128xbf16>, vector<16x128xf32> -> vector<16x128xf32>
    %7 = arith.addf %3, %6 : vector<16x128xf32>
    %c0_6 = arith.constant 0 : index
    %c0_7 = arith.constant 0 : index
    %8 = vector.load %arg6[%c0_6, %c0_7] : memref<16x128xf32, #tpu.memory_space<vmem>>, vector<16x128xf32>
    tpu.vector_store %arg6[%c0_6, %c0_7], %7 {strides = array<i32>} : memref<16x128xf32, #tpu.memory_space<vmem>>, vector<16x128xf32>,
    %c0_i32_8 = arith.constant 0 : i32
    %9 = arith.cmpi eq, %arg1, %c0_i32_8 : i32
    %10 = arith.extui %9 : i1 to i32
    %c0_i32_9 = arith.constant 0 : i32
    %11 = arith.cmpi ne, %10, %c0_i32_9 : i32
    scf.if %11 {
      %c0_10 = arith.constant 0 : index
      %c0_11 = arith.constant 0 : index
      %12 = vector.load %arg6[%c0_10, %c0_11] : memref<16x128xf32, #tpu.memory_space<vmem>>, vector<16x128xf32>
      %c0_12 = arith.constant 0 : index
      %c0_13 = arith.constant 0 : index
      %13 = vector.load %arg4[%c0_12, %c0_13] : memref<1x128xf32, #tpu.memory_space<vmem>>, vector<1x128xf32>
      %14 = vector.broadcast %13 : vector<1x128xf32> to vector<16x128xf32>
      %15 = arith.addf %12, %14 : vector<16x128xf32>
      %16 = arith.truncf %15 : vector<16x128xf32> to vector<16x128xbf16>
      %c0_14 = arith.constant 0 : index
      %c0_15 = arith.constant 0 : index
      %17 = vector.load %arg5[%c0_14, %c0_15] : memref<16x128xbf16, #tpu.memory_space<vmem>>, vector<16x128xbf16>
      tpu.vector_store %arg5[%c0_14, %c0_15], %16 {strides = array<i32>} : memref<16x128xbf16, #tpu.memory_space<vmem>>, vector<16x128xbf16>,
    } else {
    }
    return
  }
  func.func @transform_0(%arg0: i32, %arg1: i32) -> (i32, i32) {
    %c0_i32 = arith.constant 0 : i32
    return %arg0, %arg1 : i32, i32
  }
  func.func @transform_1(%arg0: i32, %arg1: i32) -> (i32, i32) {
    %c0_i32 = arith.constant 0 : i32
    %c0_i32_0 = arith.constant 0 : i32
    return %arg1, %c0_i32 : i32, i32
  }
  func.func @transform_2(%arg0: i32, %arg1: i32) -> (i32, i32) {
    %c0_i32 = arith.constant 0 : i32
    %c0_i32_0 = arith.constant 0 : i32
    %c0_i32_1 = arith.constant 0 : i32
    return %c0_i32, %c0_i32_0 : i32, i32
  }
  func.func @transform_3(%arg0: i32, %arg1: i32) -> (i32, i32) {
    %c0_i32 = arith.constant 0 : i32
    %c0_i32_0 = arith.constant 0 : i32
    return %arg0, %c0_i32 : i32, i32
  }
}

</mosaic_0001>

<bundles_post_ra>
// kernel: tpu_custom_call.1
= control target key start
LH: loop header
LB: loop body
LE: loop exit
PB: predicated region body
PF: predicated region fallthrough
CT: control target
= control target key end

     0   :  { %8 = vsyncpa [#allocation4], 0  ;;  %s380_s0 = inlined_call_operand.hbm [shape: bf16[16,112], index: 0, kind: input, shape index: {}]   ;;  %s381_s1 = inlined_call_operand.hbm [shape: bf16[112,128], index: 1, kind: input, shape index: {}]   ;;  %s382_s2 = inlined_call_operand.vmem [shape: f32[1,128], index: 2, kind: input, shape index: {}]   ;;  %s383_s3 = inlined_call_operand.hbm [shape: bf16[16,128], index: 3, kind: output, shape index: {}]  }
   0x1   :  { %9 = vsyncpa [#allocation7], 0 }
   0x2   :  { %10 = vsyncpa [#allocation5], 0  ;;  %s332_s12 = smov [#allocation3]  }
   0x3   :  { %s16_s13 = sshll.u32 %s332_s12, 4  ;;  %s17_s13 = int_to_ptr.vmem [resolvable:$true] %s16_s13 }
   0x4   :  { %s274_s14 = scalar_lea.vmem %s17_s13, 128  ;;  %p279_p1 = scmp.lt.s32.totalorder %s17_s13, %s17_s13 }
   0x5   :  { %p275_p0 = scmp.ne.s32.totalorder %s17_s13, %s274_s14  ;;  %p280_p2 = scmp.lt.s32.totalorder %s274_s14, %s274_s14 }
   0x7   :  { %p281_p3 = por %p280_p2, %p279_p1 }
   0x9   :  { %p282_p4 = pnand %p281_p3, %p275_p0 }
   0xb   :  { %285 = shalt.err (!%p282_p4)
}
   0xc   :  { %s333_s15 = smov 64   ;;  %s334_s16 = smov 4  }
   0xd   :  { %22 = dma.hbm_to_vmem [thread:$0]  %s380_s0, 128, %s17_s13, [#allocation4], %s333_s15, %s333_s15, %s334_s16  }
   0xe   :  { %s335_s19 = smov [#allocation6]  }
   0xf   :  { %s28_s20 = sshll.u32 %s335_s19, 4  ;;  %s29_s20 = int_to_ptr.vmem [resolvable:$true] %s28_s20 }
  0x10   :  { %s294_s21 = scalar_lea.vmem %s29_s20, 896  ;;  %p299_p6 = scmp.lt.s32.totalorder %s29_s20, %s29_s20 }
  0x11   :  { %p295_p5 = scmp.ne.s32.totalorder %s29_s20, %s294_s21  ;;  %p300_p7 = scmp.lt.s32.totalorder %s294_s21, %s294_s21 }
  0x13   :  { %p301_p8 = por %p300_p7, %p299_p6 }
  0x15   :  { %p302_p9 = pnand %p301_p8, %p295_p5 }
  0x17   :  { %305 = shalt.err (!%p302_p9)
}
  0x18   :  { %34 = dma.hbm_to_vmem [thread:$0]  %s381_s1, 896, %s29_s20, [#allocation7], %s333_s15, %s333_s15, %s334_s16  }
  0x19   :  { %326 = dma.done.wait [#allocation4], 128  }
  0x1a   :  { %327 = vsyncadd [#allocation4], 4294967168 }
  0x1b   :  { %328 = dma.done.wait [#allocation7], 896  }
  0x1c   :  { %329 = vsyncadd [#allocation7], 4294966400  ;;  %v336_v0 = vmov 0.0   ;;  %vm337_vm0 = vmmov 0   ;;  %v258_v1 = vld [vmem:[#allocation6 + $0x30] sm:$0xff]   ;;  %v259_v2 = vld [vmem:[#allocation6 + $0x28] sm:$0xff]  }
  0x1d   :  { %233 = vmatprep.subr.bf16.mxu0 %v336_v0  ;;  %247 = vmatprep.mubr.msk.bf16.mxu0 %vm337_vm0, %v336_v0  ;;  %v260_v3 = vld [vmem:[#allocation6 + $0x20] sm:$0xff]   ;;  %v261_v4 = vld [vmem:[#allocation6 + $0x18] sm:$0xff]   ;;  %v262_v5 = vld [vmem:[#allocation6 + $0x10] sm:$0xff]   ;;  %vm115_vm1 = vcmask 916480   ;;  %s338_s24 = smov [#allocation8]  }
  0x1e   :  { %234 = vmatpush3.bf16.msra.mxu0 %v258_v1  ;;  %v263_v6 = vld [vmem:[#allocation6 + $0x8] sm:$0xff]   ;;  %v264_v7 = vld [vmem:[#allocation6] sm:$0xff]   ;;  %v265_v8 = vld [vmem:[#allocation3] sm:$0xff]   ;;  %s193_s25 = sshll.u32 %s338_s24, 4  ;;  %s194_s25 = int_to_ptr.vmem [resolvable:$true] %s193_s25 }
  0x1f   :  { %235 = vmatprep.subr.bf16.mxu0 %v336_v0  ;;  %v215_v10 = vld [vmem:[%s382_s2] ss:$0 sm:$0xff]  ;;  %s306_s26 = scalar_lea.vmem %s194_s25, 128  ;;  %p311_p11 = scmp.lt.s32.totalorder %s194_s25, %s194_s25 }
  0x20   :  { %p307_p10 = scmp.ne.s32.totalorder %s194_s25, %s306_s26  ;;  %p312_p12 = scmp.lt.s32.totalorder %s306_s26, %s306_s26 }
  0x22   :  { %236 = vmatpush3.bf16.msra.mxu0 %v259_v2  ;;  %p313_p13 = por %p312_p12, %p311_p11 }
  0x23   :  { %237 = vmatprep.subr.bf16.mxu0 %v336_v0 }
  0x24   :  { %p314_p0 = pnand %p313_p13, %p307_p10 }
  0x26   :  { %238 = vmatpush3.bf16.msra.mxu0 %v260_v3 }
  0x27   :  { %239 = vmatprep.subr.bf16.mxu0 %v336_v0 }
  0x2a   :  { %240 = vmatpush3.bf16.msra.mxu0 %v261_v4 }
  0x2b   :  { %241 = vmatprep.subr.bf16.mxu0 %v336_v0 }
  0x2e   :  { %242 = vmatpush3.bf16.msra.mxu0 %v262_v5 }
  0x2f   :  { %243 = vmatprep.subr.bf16.mxu0 %v336_v0 }
  0x32   :  { %244 = vmatpush3.bf16.msra.mxu0 %v263_v6 }
  0x33   :  { %245 = vmatprep.subr.bf16.mxu0 %v336_v0 }
  0x36   :  { %246 = vmatpush3.bf16.msra.mxu0 %v264_v7 }
  0x39   :  { %248 = vmatmul.mubr.msk.bf16.vlgmr.msra.gmra.mxu0 %vm115_vm1, %v265_v8 }
  0xf9   :  { %v153_v9 = vpop.f32.mrf.mxu0 }
  0xfa   :  { %v176_v13 = vadd.f32 %v215_v10, %v153_v9 }
  0xfb   :  { %v249_v11 = vpop.f32.mrf.mxu0 }
  0xfd   :  { %v156_v12 = vpop.f32.mrf.mxu0 }
  0xfe   :  { %v177_v14 = vadd.f32 %v215_v10, %v156_v12 }
  0xff   :  { %v250_v15 = vpop.f32.mrf.mxu0 }
 0x100   :  { %v223_v16 = vpack.c.bf16 %v177_v14, %v176_v13 }
 0x102   :  { %224 = vst [vmem:[#allocation8] sm:$0xff] %v223_v16  }
 0x103   :  { %317 = shalt.err (!%p314_p0)
}
 0x104   :  { %199 = dma.vmem_to_hbm [thread:$0]  %s194_s25, 128, %s383_s3, [#allocation5], %s333_s15, %s333_s15, %s334_s16  }
 0x105   :  { %330 = dma.done.wait [#allocation5], 128  }
 0x106   :  { %331 = vsyncadd [#allocation5], 4294967168 }
 0x107   :  { %203 = vsyncpa [#allocation4], 1 }
 0x108   :  { %204 = vsyncpa [#allocation7], 1 }
 0x109   :  { %205 = vsyncpa [#allocation5], 1 }

</bundles_post_ra>
